<compile_context>
chip_gen: v7x
topology: tpu7x:2x2x1
jax: 0.10.0
libtpu: 0.0.40
codegen_flags: <defaults>
</compile_context>

<pallas_src>
import jax
import jax.numpy as jnp
from jax import lax
from jax.experimental import pallas as pl
from jax.experimental.pallas import tpu as pltpu

DIMENSION = 2          # implied by torch.split(input, 2, dim=2)
HIDDEN = 50
HP = 128               # lane-padded width
XOFF = 64              # lane offset where x lives (HIDDEN + DIMENSION <= 64)
N_STAGES = 10
N_FUSED = N_STAGES + 1  # 10 propagation stages + fused output stage
TM_MAX = 1024          # row-tile cap (sweepable to 2048 on v5e/v6e)
NEG = -1.0e4           # softplus(NEG) == 0.0 exactly in f32


def enforce_pos_jax(M):
    """Functional equivalent of enforce_pos (apply to RAW weights, then re-pack)."""
    eps = 5.0
    return jnp.where(M >= 0, M + jnp.exp(-eps), jnp.exp(M - eps))


def _softplus(z):
    # Stable branch-free softplus == torch.nn.Softplus(beta=1, threshold=20)
    # to f32 roundoff.
    return jnp.maximum(z, 0.0) + jnp.log1p(jnp.exp(-jnp.abs(z)))


# ------------------------------ kernel ------------------------------------

def dissipation_kernel(
    xin_ref,                                    # (TM, 4): [x0_0, x0_1, x0s_0, x0s_1]
    wxlat1_ref, bxlat1_ref, wclatin_ref, wxin_ref, bxin_ref,   # input stage (VPU)
    wa_ref, ba_ref, wb_ref, bb_ref,             # stacked fused stages (N_FUSED, ...)
    out_ref,                                    # (TM, HP): column 0 is the result
):
    xin = xin_ref[...]
    x0_0, x0_1 = xin[:, 0:1], xin[:, 1:2]
    xs_0, xs_1 = xin[:, 2:3], xin[:, 3:4]

    # Hoisted lane masks / x0_star placement (lanes HIDDEN, HIDDEN+1).
    lane = lax.broadcasted_iota(jnp.int32, (1, HP), 1)
    hi_mask = (lane >= XOFF).astype(jnp.float32)                   # (1, HP)
    sel50 = (lane == HIDDEN).astype(jnp.float32)
    sel51 = (lane == HIDDEN + 1).astype(jnp.float32)
    xs_slab = xs_0 * sel50 + xs_1 * sel51                          # (TM, HP)

    # ---- input stage: all K=2 contractions as VPU FMAs (kept in f32) ----
    A = wclatin_ref[...]                                           # (6, HP)
    clat_in = (xs_0 * (x0_0 * A[0:1] + x0_1 * A[1:2] + A[2:3])
               + xs_1 * (x0_0 * A[3:4] + x0_1 * A[4:5] + A[5:6]))
    # x_star: real at lanes 0..49, exact 0 elsewhere (NEG bias padding).
    x_star = _softplus(x0_0 * wxlat1_ref[0:1, :] + x0_1 * wxlat1_ref[1:2, :]
                       + bxlat1_ref[...] + clat_in)
    # x: real at lanes 64..113 (junk elsewhere hits zero weight rows only).
    x_slab = _softplus(x0_0 * wxin_ref[0:1, :] + x0_1 * wxin_ref[1:2, :]
                       + bxin_ref[...])

    # ---- 10 PICNN stages + fused output stage: 2 bf16 matmuls each ----
    def stage(i, carry):
        x_slab, x_star = carry
        a = jnp.dot(x_slab.astype(jnp.bfloat16), wa_ref[i],
                    preferred_element_type=jnp.float32) + ba_ref[i]
        sp_a = _softplus(a)                    # z_mid @ 0..51, new x @ 64..113
        prod = x_star * sp_a                   # x_star*z_mid @ 0..49, exact 0 elsewhere
        combined = x_slab * hi_mask + prod + a * xs_slab
        bpre = jnp.dot(combined.astype(jnp.bfloat16), wb_ref[i],
                       preferred_element_type=jnp.float32) + bb_ref[i]
        return sp_a, _softplus(bpre)           # new x_slab, new x_star

    _, x_star = lax.fori_loop(0, N_FUSED, stage, (x_slab, x_star))

    # Final x_star of the fused output stage IS the result: column 0 real,
    # columns 1..127 exactly 0 (NEG bias padding).  Lane-dense store.
    out_ref[...] = x_star


# ------------------------- parameter construction -------------------------

def _linear(key, in_dim, out_dim, bias=True):
    kw, kb = jax.random.split(key)
    std = (2.0 / (in_dim + out_dim)) ** 0.5                 # xavier_normal
    W = jax.random.normal(kw, (out_dim, in_dim), jnp.float32) * std
    b = (jax.random.normal(kb, (out_dim,), jnp.float32) * 0.05) if bias else None
    return W, b


def make_params(key):
    """Raw parameters (weights stored transposed as (in, out))."""
    keys = iter(jax.random.split(key, 128))
    p = {}

    W, b = _linear(next(keys), DIMENSION, HIDDEN)                 # x_lateral_layer_1
    p["wt_xlat1"], p["b_xlat1"] = W.T, b.reshape(1, HIDDEN)
    W, _ = _linear(next(keys), DIMENSION, HIDDEN, bias=False)     # conjugate_lateral_layer_in
    p["wt_clat_in"] = W.T
    W, b = _linear(next(keys), DIMENSION, DIMENSION)              # conjugate_lateral_layer_in_mid
    p["wt_clat_in_mid"], p["b_clat_in_mid"] = W.T, b.reshape(1, DIMENSION)
    W, b = _linear(next(keys), DIMENSION, HIDDEN)                 # x_input_layer
    p["wt_xin"], p["b_xin"] = W.T, b.reshape(1, HIDDEN)

    def stack(maker):
        Ws, bs = [], []
        for _ in range(N_STAGES):
            W, b = maker(next(keys))
            Ws.append(W)
            bs.append(b)
        return jnp.stack(Ws), (jnp.stack(bs) if bs[0] is not None else None)

    W, b = stack(lambda k: _linear(k, HIDDEN, HIDDEN))            # x_lateral_layer_2..11
    p["wt_xlat"], p["b_xlat"] = W.transpose(0, 2, 1), b.reshape(N_STAGES, 1, HIDDEN)
    W, _ = stack(lambda k: _linear(k, HIDDEN, HIDDEN, bias=False))  # conjugate_prop_layer_1..10
    p["wt_cprop"] = W.transpose(0, 2, 1)
    W, b = stack(lambda k: _linear(k, HIDDEN, HIDDEN))            # conjugate_prop_layer_*_mid
    p["wt_cprop_mid"], p["b_cprop_mid"] = W.transpose(0, 2, 1), b.reshape(N_STAGES, 1, HIDDEN)
    W, _ = stack(lambda k: _linear(k, DIMENSION, HIDDEN, bias=False))  # conjugate_lateral_layer_1..10
    p["wt_clat"] = W.transpose(0, 2, 1)
    W, b = stack(lambda k: _linear(k, HIDDEN, DIMENSION))         # conjugate_lateral_layer_*_mid
    p["wt_clat_mid"], p["b_clat_mid"] = W.transpose(0, 2, 1), b.reshape(N_STAGES, 1, DIMENSION)
    W, b = stack(lambda k: _linear(k, HIDDEN, HIDDEN))            # x_prop_layer1..10
    p["wt_xprop"], p["b_xprop"] = W.transpose(0, 2, 1), b.reshape(N_STAGES, 1, HIDDEN)

    W, b = _linear(next(keys), HIDDEN, 1)                         # x_lateral_layer_out
    p["wt_xlat_out"], p["b_xlat_out"] = W.T, b.reshape(1, 1)
    W, _ = _linear(next(keys), HIDDEN, 1, bias=False)             # conjugate_prop_layer_out
    p["wt_cprop_out"] = W.T
    W, b = _linear(next(keys), HIDDEN, HIDDEN)                    # conjugate_prop_layer_out_mid
    p["wt_cprop_out_mid"], p["b_cprop_out_mid"] = W.T, b.reshape(1, HIDDEN)
    W, _ = _linear(next(keys), DIMENSION, 1, bias=False)          # conjugate_lateral_layer_out
    p["wt_clat_out"] = W.T
    W, b = _linear(next(keys), HIDDEN, DIMENSION)                 # conjugate_lateral_layer_out_mid
    p["wt_clat_out_mid"], p["b_clat_out_mid"] = W.T, b.reshape(1, DIMENSION)
    return p


# --------------------- lane-packed layout for the kernel -------------------

def pack_params(p):
    """Pad / fuse raw params into the bf16 lane-packed layout.

    Must be called on RAW params (apply enforce_pos_jax to raw params first,
    never to the packed slabs).
    """
    f32 = jnp.float32
    k = {}

    # ---- input stage (VPU path, f32) ----
    k["wxlat1"] = jnp.zeros((DIMENSION, HP), f32).at[:, :HIDDEN].set(p["wt_xlat1"])
    k["bxlat1"] = jnp.full((1, HP), NEG, f32).at[:, :HIDDEN].set(p["b_xlat1"])
    k["wxin"] = jnp.zeros((DIMENSION, HP), f32).at[:, XOFF:XOFF + HIDDEN].set(p["wt_xin"])
    k["bxin"] = jnp.zeros((1, HP), f32).at[:, XOFF:XOFF + HIDDEN].set(p["b_xin"])
    # Fold the 2x2 conjugate_lateral_layer_in_mid (and bias) into the
    # conjugate_lateral_layer_in rows: term = sum_j x0s_j*(x0@Wm+bm)_j * c_j.
    wm = jnp.asarray(p["wt_clat_in_mid"], f32)       # (2, 2) [in, out]
    bm = jnp.asarray(p["b_clat_in_mid"], f32)[0]     # (2,)
    rows = []
    for j in range(DIMENSION):
        cj = jnp.zeros((HP,), f32).at[:HIDDEN].set(p["wt_clat_in"][j])
        rows += [wm[0, j] * cj, wm[1, j] * cj, bm[j] * cj]
    k["wclatin"] = jnp.stack(rows)                   # (6, HP)

    # ---- stacked fused stages (10 PICNN stages + output stage) ----
    wa = jnp.zeros((N_FUSED, HP, HP), f32)
    ba = jnp.zeros((N_FUSED, 1, HP), f32)
    wb = jnp.zeros((N_FUSED, HP, HP), f32)
    bb = jnp.full((N_FUSED, 1, HP), NEG, f32)        # -> exact 0 in padded x_star lanes

    # matmul A: x (rows 64..113) -> [cprop_mid | clat_mid fold | xprop]
    wa = wa.at[:N_STAGES, XOFF:XOFF + HIDDEN, :HIDDEN].set(p["wt_cprop_mid"])
    wa = wa.at[:N_STAGES, XOFF:XOFF + HIDDEN, HIDDEN:HIDDEN + DIMENSION].set(p["wt_clat_mid"])
    wa = wa.at[:N_STAGES, XOFF:XOFF + HIDDEN, XOFF:XOFF + HIDDEN].set(p["wt_xprop"])
    ba = ba.at[:N_STAGES, :, :HIDDEN].set(p["b_cprop_mid"])
    ba = ba.at[:N_STAGES, :, HIDDEN:HIDDEN + DIMENSION].set(p["b_clat_mid"])
    ba = ba.at[:N_STAGES, :, XOFF:XOFF + HIDDEN].set(p["b_xprop"])
    # matmul B: [x_star*z_mid | x0s*lat | x] -> x_star  (cprop + clat + xlat)
    wb = wb.at[:N_STAGES, :HIDDEN, :HIDDEN].set(p["wt_cprop"])
    wb = wb.at[:N_STAGES, HIDDEN:HIDDEN + DIMENSION, :HIDDEN].set(p["wt_clat"])
    wb = wb.at[:N_STAGES, XOFF:XOFF + HIDDEN, :HIDDEN].set(p["wt_xlat"])
    bb = bb.at[:N_STAGES, :, :HIDDEN].set(p["b_xlat"])

    # fused output stage (index N_STAGES): same structure, W_b maps to col 0
    wa = wa.at[N_STAGES, XOFF:XOFF + HIDDEN, :HIDDEN].set(p["wt_cprop_out_mid"])
    wa = wa.at[N_STAGES, XOFF:XOFF + HIDDEN, HIDDEN:HIDDEN + DIMENSION].set(p["wt_clat_out_mid"])
    ba = ba.at[N_STAGES, :, :HIDDEN].set(p["b_cprop_out_mid"])
    ba = ba.at[N_STAGES, :, HIDDEN:HIDDEN + DIMENSION].set(p["b_clat_out_mid"])
    wb = wb.at[N_STAGES, :HIDDEN, 0:1].set(p["wt_cprop_out"])
    wb = wb.at[N_STAGES, HIDDEN:HIDDEN + DIMENSION, 0:1].set(p["wt_clat_out"])
    wb = wb.at[N_STAGES, XOFF:XOFF + HIDDEN, 0:1].set(p["wt_xlat_out"])
    bb = bb.at[N_STAGES, :, 0:1].set(p["b_xlat_out"])

    k["wa"] = wa.astype(jnp.bfloat16)   # MXU operands in bf16
    k["ba"] = ba
    k["wb"] = wb.astype(jnp.bfloat16)
    k["bb"] = bb
    return k


_ARG_ORDER = ["wxlat1", "bxlat1", "wclatin", "wxin", "bxin", "wa", "ba", "wb", "bb"]


# ------------------------------ wrapper ------------------------------------

def _round_up(x, m):
    return (x + m - 1) // m * m


def _choose_tm(m):
    # Target >=4 grid steps (>=2 for small M) so v7x can shard row tiles
    # across its two TensorCores; cap at TM_MAX; multiple of 8.
    target = max(8, _round_up(pl.cdiv(m, 4), 8))
    return min(TM_MAX, target)


def _resident_spec(a):
    nd = a.ndim
    return pl.BlockSpec(a.shape, lambda i, _nd=nd: (0,) * _nd)


@jax.jit
def dissipation_forward(inp, packed):
    """inp: (B, T, 2*DIMENSION) float -> (B, T, 1) float32."""
    B, T, F = inp.shape
    assert F == 2 * DIMENSION
    M = B * T
    flat = inp.astype(jnp.float32).reshape(M, F)

    TM = _choose_tm(M)
    M_pad = _round_up(M, TM)
    if M_pad != M:
        flat = jnp.pad(flat, ((0, M_pad - M), (0, 0)))

    args = [flat] + [packed[k] for k in _ARG_ORDER]
    in_specs = [pl.BlockSpec((TM, F), lambda i: (i, 0))]
    in_specs += [_resident_spec(packed[k]) for k in _ARG_ORDER]
    out_specs = pl.BlockSpec((TM, HP), lambda i: (i, 0))

    weight_bytes = sum(int(packed[k].size) * packed[k].dtype.itemsize
                       for k in _ARG_ORDER)
    cost = pl.CostEstimate(
        flops=2 * HP * HP * 2 * N_FUSED * M_pad,
        transcendentals=2 * (2 * N_FUSED + 2) * HP * M_pad,
        bytes_accessed=M_pad * (F + HP) * 4 + weight_bytes,
    )

    out = pl.pallas_call(
        dissipation_kernel,
        out_shape=jax.ShapeDtypeStruct((M_pad, HP), jnp.float32),
        grid=(M_pad // TM,),
        in_specs=in_specs,
        out_specs=out_specs,
        compiler_params=pltpu.CompilerParams(
            dimension_semantics=("parallel",),
            vmem_limit_bytes=48 * 1024 * 1024,
        ),
        cost_estimate=cost,
    )(*args)
    return out[:M, 0:1].reshape(B, T, 1)


# ------------------------------ reference ----------------------------------

def reference_forward(inp, p, matmul_dtype=jnp.float32):
    """Pure-JAX reference mirroring the PyTorch forward.

    matmul_dtype=bfloat16 mimics the kernel's mixed-precision MXU numerics
    (bf16 operands, f32 accumulation) for a tight correctness check.
    """
    B, T, F = inp.shape
    flat = inp.astype(jnp.float32).reshape(B * T, F)
    x0, x0s = flat[:, :DIMENSION], flat[:, DIMENSION:]
    sp = _softplus

    def mm(a, w):
        return jnp.dot(a.astype(matmul_dtype),
                       jnp.asarray(w).astype(matmul_dtype),
                       preferred_element_type=jnp.float32)

    # input stage stays f32 (VPU path in the kernel)
    mid_in = x0 @ p["wt_clat_in_mid"] + p["b_clat_in_mid"]
    x_star = sp(x0 @ p["wt_xlat1"] + p["b_xlat1"] + (x0s * mid_in) @ p["wt_clat_in"])
    x = sp(x0 @ p["wt_xin"] + p["b_xin"])
    for i in range(N_STAGES):
        z_mid = sp(mm(x, p["wt_cprop_mid"][i]) + p["b_cprop_mid"][i])
        lat_mid = mm(x, p["wt_clat_mid"][i]) + p["b_clat_mid"][i]
        x_star = sp(mm(x, p["wt_xlat"][i]) + p["b_xlat"][i]
                    + mm(x_star * z_mid, p["wt_cprop"][i])
                    + mm(x0s * lat_mid, p["wt_clat"][i]))
        x = sp(mm(x, p["wt_xprop"][i]) + p["b_xprop"][i])
    z_mid = sp(mm(x, p["wt_cprop_out_mid"]) + p["b_cprop_out_mid"])
    lat_mid = mm(x, p["wt_clat_out_mid"]) + p["b_clat_out_mid"]
    out = sp(mm(x, p["wt_xlat_out"]) + p["b_xlat_out"]
             + mm(x_star * z_mid, p["wt_cprop_out"])
             + mm(x0s * lat_mid, p["wt_clat_out"]))
    return out.reshape(B, T, 1)


if __name__ == "__main__":
    key = jax.random.PRNGKey(0)
    k_inp, k_par = jax.random.split(key)

    B, T = 2, 8
    inp = jax.random.normal(k_inp, (B, T, 2 * DIMENSION), jnp.float32)
    params = make_params(k_par)
    packed = pack_params(params)

    out = jax.block_until_ready(dissipation_forward(inp, packed))
    assert out.shape == (B, T, 1)

    # Tight check against a reference that mimics the kernel's bf16-MXU /
    # f32-accumulate numerics (validates the lane packing / fusion).
    ref_bf16 = reference_forward(inp, params, matmul_dtype=jnp.bfloat16)
    d16 = float(jnp.max(jnp.abs(out - ref_bf16)))
    assert jnp.allclose(out, ref_bf16, rtol=2e-3, atol=2e-3), f"vs bf16 ref: {d16}"

    # Looser check against the full-f32 reference (expected bf16 drift).
    ref_f32 = reference_forward(inp, params, matmul_dtype=jnp.float32)
    d32 = float(jnp.max(jnp.abs(out - ref_f32)))
    assert jnp.allclose(out, ref_f32, rtol=5e-2, atol=5e-2), f"vs f32 ref: {d32}"

    # Post-use weight mutation (stateful in PyTorch): functional form applied
    # to RAW params only; caller must re-run pack_params afterwards.
    _ = jax.block_until_ready(enforce_pos_jax(params["wt_cprop"]))

    print("KERNEL_OK")
</pallas_src>

<mosaic_0001>
module attributes {stable_mosaic.version = 11 : i64} {
  func.func @dissipation_kernel(%arg0: i32, %arg1: memref<8x4xf32, #tpu.memory_space<vmem>>, %arg2: memref<2x128xf32, #tpu.memory_space<vmem>>, %arg3: memref<1x128xf32, #tpu.memory_space<vmem>>, %arg4: memref<6x128xf32, #tpu.memory_space<vmem>>, %arg5: memref<2x128xf32, #tpu.memory_space<vmem>>, %arg6: memref<1x128xf32, #tpu.memory_space<vmem>>, %arg7: memref<11x128x128xbf16, #tpu.memory_space<vmem>>, %arg8: memref<11x1x128xf32, #tpu.memory_space<vmem>>, %arg9: memref<11x128x128xbf16, #tpu.memory_space<vmem>>, %arg10: memref<11x1x128xf32, #tpu.memory_space<vmem>>, %arg11: memref<8x128xf32, #tpu.memory_space<vmem>>) attributes {dimension_semantics = [#tpu.dimension_semantics<parallel>], iteration_bounds = array<i64: 2>, scalar_prefetch = 0 : i64, scratch_operands = 0 : i64, tpu.core_type = #tpu.core_type<tc>, window_params = [{transform_indices = @transform_0, window_bounds = array<i64: 8, 4>}, {pipeline_mode = #tpu.pipeline_mode<synchronous>, transform_indices = @transform_1, window_bounds = array<i64: 2, 128>}, {pipeline_mode = #tpu.pipeline_mode<synchronous>, transform_indices = @transform_2, window_bounds = array<i64: 1, 128>}, {pipeline_mode = #tpu.pipeline_mode<synchronous>, transform_indices = @transform_3, window_bounds = array<i64: 6, 128>}, {pipeline_mode = #tpu.pipeline_mode<synchronous>, transform_indices = @transform_4, window_bounds = array<i64: 2, 128>}, {pipeline_mode = #tpu.pipeline_mode<synchronous>, transform_indices = @transform_5, window_bounds = array<i64: 1, 128>}, {pipeline_mode = #tpu.pipeline_mode<synchronous>, transform_indices = @transform_6, window_bounds = array<i64: 11, 128, 128>}, {pipeline_mode = #tpu.pipeline_mode<synchronous>, transform_indices = @transform_7, window_bounds = array<i64: 11, 1, 128>}, {pipeline_mode = #tpu.pipeline_mode<synchronous>, transform_indices = @transform_8, window_bounds = array<i64: 11, 128, 128>}, {pipeline_mode = #tpu.pipeline_mode<synchronous>, transform_indices = @transform_9, window_bounds = array<i64: 11, 1, 128>}, {transform_indices = @transform_10, window_bounds = array<i64: 8, 128>}]} {
    %c0 = arith.constant 0 : index
    %c0_0 = arith.constant 0 : index
    %0 = vector.load %arg1[%c0, %c0_0] : memref<8x4xf32, #tpu.memory_space<vmem>>, vector<8x4xf32>
    %1 = vector.extract_strided_slice %0 {offsets = [0, 0], sizes = [8, 1], strides = [1, 1]} : vector<8x4xf32> to vector<8x1xf32>
    %2 = vector.extract_strided_slice %0 {offsets = [0, 1], sizes = [8, 1], strides = [1, 1]} : vector<8x4xf32> to vector<8x1xf32>
    %3 = vector.extract_strided_slice %0 {offsets = [0, 2], sizes = [8, 1], strides = [1, 1]} : vector<8x4xf32> to vector<8x1xf32>
    %4 = vector.extract_strided_slice %0 {offsets = [0, 3], sizes = [8, 1], strides = [1, 1]} : vector<8x4xf32> to vector<8x1xf32>
    %5 = tpu.iota {dimensions = array<i32: 1>} : vector<1x128xi32>
    %c64_i32 = arith.constant 64 : i32
    %6 = vector.broadcast %c64_i32 : i32 to vector<1x128xi32>
    %7 = arith.cmpi sge, %5, %6 : vector<1x128xi32>
    %8 = arith.extui %7 : vector<1x128xi1> to vector<1x128xi32>
    %9 = arith.sitofp %8 : vector<1x128xi32> to vector<1x128xf32>
    %c50_i32 = arith.constant 50 : i32
    %10 = vector.broadcast %c50_i32 : i32 to vector<1x128xi32>
    %11 = arith.cmpi eq, %5, %10 : vector<1x128xi32>
    %12 = arith.extui %11 : vector<1x128xi1> to vector<1x128xi32>
    %13 = arith.sitofp %12 : vector<1x128xi32> to vector<1x128xf32>
    %c51_i32 = arith.constant 51 : i32
    %14 = vector.broadcast %c51_i32 : i32 to vector<1x128xi32>
    %15 = arith.cmpi eq, %5, %14 : vector<1x128xi32>
    %16 = arith.extui %15 : vector<1x128xi1> to vector<1x128xi32>
    %17 = arith.sitofp %16 : vector<1x128xi32> to vector<1x128xf32>
    %18 = vector.broadcast %3 : vector<8x1xf32> to vector<8x128xf32>
    %19 = vector.broadcast %13 : vector<1x128xf32> to vector<8x128xf32>
    %20 = arith.mulf %18, %19 : vector<8x128xf32>
    %21 = vector.broadcast %4 : vector<8x1xf32> to vector<8x128xf32>
    %22 = vector.broadcast %17 : vector<1x128xf32> to vector<8x128xf32>
    %23 = arith.mulf %21, %22 : vector<8x128xf32>
    %24 = arith.addf %20, %23 : vector<8x128xf32>
    %c0_1 = arith.constant 0 : index
    %c0_2 = arith.constant 0 : index
    %25 = vector.load %arg4[%c0_1, %c0_2] : memref<6x128xf32, #tpu.memory_space<vmem>>, vector<6x128xf32>
    %26 = vector.extract_strided_slice %25 {offsets = [0, 0], sizes = [1, 128], strides = [1, 1]} : vector<6x128xf32> to vector<1x128xf32>
    %27 = vector.broadcast %1 : vector<8x1xf32> to vector<8x128xf32>
    %28 = vector.broadcast %26 : vector<1x128xf32> to vector<8x128xf32>
    %29 = arith.mulf %27, %28 : vector<8x128xf32>
    %30 = vector.extract_strided_slice %25 {offsets = [1, 0], sizes = [1, 128], strides = [1, 1]} : vector<6x128xf32> to vector<1x128xf32>
    %31 = vector.broadcast %2 : vector<8x1xf32> to vector<8x128xf32>
    %32 = vector.broadcast %30 : vector<1x128xf32> to vector<8x128xf32>
    %33 = arith.mulf %31, %32 : vector<8x128xf32>
    %34 = arith.addf %29, %33 : vector<8x128xf32>
    %35 = vector.extract_strided_slice %25 {offsets = [2, 0], sizes = [1, 128], strides = [1, 1]} : vector<6x128xf32> to vector<1x128xf32>
    %36 = vector.broadcast %35 : vector<1x128xf32> to vector<8x128xf32>
    %37 = arith.addf %34, %36 : vector<8x128xf32>
    %38 = vector.broadcast %3 : vector<8x1xf32> to vector<8x128xf32>
    %39 = arith.mulf %38, %37 : vector<8x128xf32>
    %40 = vector.extract_strided_slice %25 {offsets = [3, 0], sizes = [1, 128], strides = [1, 1]} : vector<6x128xf32> to vector<1x128xf32>
    %41 = vector.broadcast %1 : vector<8x1xf32> to vector<8x128xf32>
    %42 = vector.broadcast %40 : vector<1x128xf32> to vector<8x128xf32>
    %43 = arith.mulf %41, %42 : vector<8x128xf32>
    %44 = vector.extract_strided_slice %25 {offsets = [4, 0], sizes = [1, 128], strides = [1, 1]} : vector<6x128xf32> to vector<1x128xf32>
    %45 = vector.broadcast %2 : vector<8x1xf32> to vector<8x128xf32>
    %46 = vector.broadcast %44 : vector<1x128xf32> to vector<8x128xf32>
    %47 = arith.mulf %45, %46 : vector<8x128xf32>
    %48 = arith.addf %43, %47 : vector<8x128xf32>
    %49 = vector.extract_strided_slice %25 {offsets = [5, 0], sizes = [1, 128], strides = [1, 1]} : vector<6x128xf32> to vector<1x128xf32>
    %50 = vector.broadcast %49 : vector<1x128xf32> to vector<8x128xf32>
    %51 = arith.addf %48, %50 : vector<8x128xf32>
    %52 = vector.broadcast %4 : vector<8x1xf32> to vector<8x128xf32>
    %53 = arith.mulf %52, %51 : vector<8x128xf32>
    %54 = arith.addf %39, %53 : vector<8x128xf32>
    %c0_3 = arith.constant 0 : index
    %c0_4 = arith.constant 0 : index
    %55 = vector.load %arg2[%c0_3, %c0_4] : memref<2x128xf32, #tpu.memory_space<vmem>>, vector<1x128xf32>
    %56 = vector.broadcast %1 : vector<8x1xf32> to vector<8x128xf32>
    %57 = vector.broadcast %55 : vector<1x128xf32> to vector<8x128xf32>
    %58 = arith.mulf %56, %57 : vector<8x128xf32>
    %c1 = arith.constant 1 : index
    %c0_5 = arith.constant 0 : index
    %59 = vector.load %arg2[%c1, %c0_5] : memref<2x128xf32, #tpu.memory_space<vmem>>, vector<1x128xf32>
    %60 = vector.broadcast %2 : vector<8x1xf32> to vector<8x128xf32>
    %61 = vector.broadcast %59 : vector<1x128xf32> to vector<8x128xf32>
    %62 = arith.mulf %60, %61 : vector<8x128xf32>
    %63 = arith.addf %58, %62 : vector<8x128xf32>
    %c0_6 = arith.constant 0 : index
    %c0_7 = arith.constant 0 : index
    %64 = vector.load %arg3[%c0_6, %c0_7] : memref<1x128xf32, #tpu.memory_space<vmem>>, vector<1x128xf32>
    %65 = vector.broadcast %64 : vector<1x128xf32> to vector<8x128xf32>
    %66 = arith.addf %63, %65 : vector<8x128xf32>
    %67 = arith.addf %66, %54 : vector<8x128xf32>
    %cst = arith.constant 0.000000e+00 : f32
    %68 = vector.broadcast %cst : f32 to vector<8x128xf32>
    %69 = arith.maximumf %67, %68 : vector<8x128xf32>
    %70 = math.absf %67 : vector<8x128xf32>
    %cst_8 = arith.constant 0.000000e+00 : f32
    %71 = vector.broadcast %cst_8 : f32 to vector<8x128xf32>
    %72 = arith.subf %71, %70 : vector<8x128xf32>
    %73 = math.exp %72 : vector<8x128xf32>
    %74 = math.log1p %73 : vector<8x128xf32>
    %75 = arith.addf %69, %74 : vector<8x128xf32>
    %c0_9 = arith.constant 0 : index
    %c0_10 = arith.constant 0 : index
    %76 = vector.load %arg5[%c0_9, %c0_10] : memref<2x128xf32, #tpu.memory_space<vmem>>, vector<1x128xf32>
    %77 = vector.broadcast %1 : vector<8x1xf32> to vector<8x128xf32>
    %78 = vector.broadcast %76 : vector<1x128xf32> to vector<8x128xf32>
    %79 = arith.mulf %77, %78 : vector<8x128xf32>
    %c1_11 = arith.constant 1 : index
    %c0_12 = arith.constant 0 : index
    %80 = vector.load %arg5[%c1_11, %c0_12] : memref<2x128xf32, #tpu.memory_space<vmem>>, vector<1x128xf32>
    %81 = vector.broadcast %2 : vector<8x1xf32> to vector<8x128xf32>
    %82 = vector.broadcast %80 : vector<1x128xf32> to vector<8x128xf32>
    %83 = arith.mulf %81, %82 : vector<8x128xf32>
    %84 = arith.addf %79, %83 : vector<8x128xf32>
    %c0_13 = arith.constant 0 : index
    %c0_14 = arith.constant 0 : index
    %85 = vector.load %arg6[%c0_13, %c0_14] : memref<1x128xf32, #tpu.memory_space<vmem>>, vector<1x128xf32>
    %86 = vector.broadcast %85 : vector<1x128xf32> to vector<8x128xf32>
    %87 = arith.addf %84, %86 : vector<8x128xf32>
    %cst_15 = arith.constant 0.000000e+00 : f32
    %88 = vector.broadcast %cst_15 : f32 to vector<8x128xf32>
    %89 = arith.maximumf %87, %88 : vector<8x128xf32>
    %90 = math.absf %87 : vector<8x128xf32>
    %cst_16 = arith.constant 0.000000e+00 : f32
    %91 = vector.broadcast %cst_16 : f32 to vector<8x128xf32>
    %92 = arith.subf %91, %90 : vector<8x128xf32>
    %93 = math.exp %92 : vector<8x128xf32>
    %94 = math.log1p %93 : vector<8x128xf32>
    %95 = arith.addf %89, %94 : vector<8x128xf32>
    %c0_i32 = arith.constant 0 : i32
    %c11_i32 = arith.constant 11 : i32
    %96 = arith.addi %c0_i32, %c11_i32 : i32
    %c1_i32 = arith.constant 1 : i32
    %97:2 = scf.for %arg12 = %c0_i32 to %96 step %c1_i32 iter_args(%arg13 = %95, %arg14 = %75) -> (vector<8x128xf32>, vector<8x128xf32>)  : i32 {
      %99 = arith.truncf %arg13 : vector<8x128xf32> to vector<8x128xbf16>
      %100 = arith.index_cast %arg12 : i32 to index
      %c0_20 = arith.constant 0 : index
      %c0_21 = arith.constant 0 : index
      %101 = vector.load %arg7[%100, %c0_20, %c0_21] : memref<11x128x128xbf16, #tpu.memory_space<vmem>>, vector<1x128x128xbf16>
      %102 = vector.shape_cast %101 : vector<1x128x128xbf16> to vector<128x128xbf16>
      %cst_22 = arith.constant dense<0.000000e+00> : vector<8x128xf32>
      %103 = tpu.matmul %99, %102, %cst_22 {dimension_numbers = #tpu.dot_dimension_numbers<[1], [0], [0], [1], [0, 0, 1, 1], [], []>} : vector<8x128xbf16>, vector<128x128xbf16>, vector<8x128xf32> -> vector<8x128xf32>
      %104 = arith.index_cast %arg12 : i32 to index
      %c0_23 = arith.constant 0 : index
      %c0_24 = arith.constant 0 : index
      %105 = vector.load %arg8[%104, %c0_23, %c0_24] : memref<11x1x128xf32, #tpu.memory_space<vmem>>, vector<1x1x128xf32>
      %106 = vector.shape_cast %105 : vector<1x1x128xf32> to vector<1x128xf32>
      %107 = vector.broadcast %106 : vector<1x128xf32> to vector<8x128xf32>
      %108 = arith.addf %103, %107 : vector<8x128xf32>
      %cst_25 = arith.constant 0.000000e+00 : f32
      %109 = vector.broadcast %cst_25 : f32 to vector<8x128xf32>
      %110 = arith.maximumf %108, %109 : vector<8x128xf32>
      %111 = math.absf %108 : vector<8x128xf32>
      %cst_26 = arith.constant 0.000000e+00 : f32
      %112 = vector.broadcast %cst_26 : f32 to vector<8x128xf32>
      %113 = arith.subf %112, %111 : vector<8x128xf32>
      %114 = math.exp %113 : vector<8x128xf32>
      %115 = math.log1p %114 : vector<8x128xf32>
      %116 = arith.addf %110, %115 : vector<8x128xf32>
      %117 = arith.mulf %arg14, %116 : vector<8x128xf32>
      %118 = vector.broadcast %9 : vector<1x128xf32> to vector<8x128xf32>
      %119 = arith.mulf %arg13, %118 : vector<8x128xf32>
      %120 = arith.addf %119, %117 : vector<8x128xf32>
      %121 = arith.mulf %108, %24 : vector<8x128xf32>
      %122 = arith.addf %120, %121 : vector<8x128xf32>
      %123 = arith.truncf %122 : vector<8x128xf32> to vector<8x128xbf16>
      %124 = arith.index_cast %arg12 : i32 to index
      %c0_27 = arith.constant 0 : index
      %c0_28 = arith.constant 0 : index
      %125 = vector.load %arg9[%124, %c0_27, %c0_28] : memref<11x128x128xbf16, #tpu.memory_space<vmem>>, vector<1x128x128xbf16>
      %126 = vector.shape_cast %125 : vector<1x128x128xbf16> to vector<128x128xbf16>
      %cst_29 = arith.constant dense<0.000000e+00> : vector<8x128xf32>
      %127 = tpu.matmul %123, %126, %cst_29 {dimension_numbers = #tpu.dot_dimension_numbers<[1], [0], [0], [1], [0, 0, 1, 1], [], []>} : vector<8x128xbf16>, vector<128x128xbf16>, vector<8x128xf32> -> vector<8x128xf32>
      %128 = arith.index_cast %arg12 : i32 to index
      %c0_30 = arith.constant 0 : index
      %c0_31 = arith.constant 0 : index
      %129 = vector.load %arg10[%128, %c0_30, %c0_31] : memref<11x1x128xf32, #tpu.memory_space<vmem>>, vector<1x1x128xf32>
      %130 = vector.shape_cast %129 : vector<1x1x128xf32> to vector<1x128xf32>
      %131 = vector.broadcast %130 : vector<1x128xf32> to vector<8x128xf32>
      %132 = arith.addf %127, %131 : vector<8x128xf32>
      %cst_32 = arith.constant 0.000000e+00 : f32
      %133 = vector.broadcast %cst_32 : f32 to vector<8x128xf32>
      %134 = arith.maximumf %132, %133 : vector<8x128xf32>
      %135 = math.absf %132 : vector<8x128xf32>
      %cst_33 = arith.constant 0.000000e+00 : f32
      %136 = vector.broadcast %cst_33 : f32 to vector<8x128xf32>
      %137 = arith.subf %136, %135 : vector<8x128xf32>
      %138 = math.exp %137 : vector<8x128xf32>
      %139 = math.log1p %138 : vector<8x128xf32>
      %140 = arith.addf %134, %139 : vector<8x128xf32>
      scf.yield %116, %140 : vector<8x128xf32>, vector<8x128xf32>
    }
    %c11_i32_17 = arith.constant 11 : i32
    %c0_18 = arith.constant 0 : index
    %c0_19 = arith.constant 0 : index
    %98 = vector.load %arg11[%c0_18, %c0_19] : memref<8x128xf32, #tpu.memory_space<vmem>>, vector<8x128xf32>
    tpu.vector_store %arg11[%c0_18, %c0_19], %97#1 {strides = array<i32>} : memref<8x128xf32, #tpu.memory_space<vmem>>, vector<8x128xf32>,
    return
  }
  func.func @transform_0(%arg0: i32) -> (i32, i32) {
    %c0_i32 = arith.constant 0 : i32
    %c0_i32_0 = arith.constant 0 : i32
    return %arg0, %c0_i32 : i32, i32
  }
  func.func @transform_1(%arg0: i32) -> (i32, i32) {
    %c0_i32 = arith.constant 0 : i32
    %c0_i32_0 = arith.constant 0 : i32
    %c0_i32_1 = arith.constant 0 : i32
    return %c0_i32, %c0_i32_0 : i32, i32
  }
  func.func @transform_2(%arg0: i32) -> (i32, i32) {
    %c0_i32 = arith.constant 0 : i32
    %c0_i32_0 = arith.constant 0 : i32
    %c0_i32_1 = arith.constant 0 : i32
    return %c0_i32, %c0_i32_0 : i32, i32
  }
  func.func @transform_3(%arg0: i32) -> (i32, i32) {
    %c0_i32 = arith.constant 0 : i32
    %c0_i32_0 = arith.constant 0 : i32
    %c0_i32_1 = arith.constant 0 : i32
    return %c0_i32, %c0_i32_0 : i32, i32
  }
  func.func @transform_4(%arg0: i32) -> (i32, i32) {
    %c0_i32 = arith.constant 0 : i32
    %c0_i32_0 = arith.constant 0 : i32
    %c0_i32_1 = arith.constant 0 : i32
    return %c0_i32, %c0_i32_0 : i32, i32
  }
  func.func @transform_5(%arg0: i32) -> (i32, i32) {
    %c0_i32 = arith.constant 0 : i32
    %c0_i32_0 = arith.constant 0 : i32
    %c0_i32_1 = arith.constant 0 : i32
    return %c0_i32, %c0_i32_0 : i32, i32
  }
  func.func @transform_6(%arg0: i32) -> (i32, i32, i32) {
    %c0_i32 = arith.constant 0 : i32
    %c0_i32_0 = arith.constant 0 : i32
    %c0_i32_1 = arith.constant 0 : i32
    %c0_i32_2 = arith.constant 0 : i32
    return %c0_i32, %c0_i32_0, %c0_i32_1 : i32, i32, i32
  }
  func.func @transform_7(%arg0: i32) -> (i32, i32, i32) {
    %c0_i32 = arith.constant 0 : i32
    %c0_i32_0 = arith.constant 0 : i32
    %c0_i32_1 = arith.constant 0 : i32
    %c0_i32_2 = arith.constant 0 : i32
    return %c0_i32, %c0_i32_0, %c0_i32_1 : i32, i32, i32
  }
  func.func @transform_8(%arg0: i32) -> (i32, i32, i32) {
    %c0_i32 = arith.constant 0 : i32
    %c0_i32_0 = arith.constant 0 : i32
    %c0_i32_1 = arith.constant 0 : i32
    %c0_i32_2 = arith.constant 0 : i32
    return %c0_i32, %c0_i32_0, %c0_i32_1 : i32, i32, i32
  }
  func.func @transform_9(%arg0: i32) -> (i32, i32, i32) {
    %c0_i32 = arith.constant 0 : i32
    %c0_i32_0 = arith.constant 0 : i32
    %c0_i32_1 = arith.constant 0 : i32
    %c0_i32_2 = arith.constant 0 : i32
    return %c0_i32, %c0_i32_0, %c0_i32_1 : i32, i32, i32
  }
  func.func @transform_10(%arg0: i32) -> (i32, i32) {
    %c0_i32 = arith.constant 0 : i32
    %c0_i32_0 = arith.constant 0 : i32
    return %arg0, %c0_i32 : i32, i32
  }
}

</mosaic_0001>

<bundles_post_ra>
// kernel: dissipation_forward.1
= control target key start
LH: loop header
LB: loop body
LE: loop exit
PB: predicated region body
PF: predicated region fallthrough
CT: control target
= control target key end

     0   :  { %15 = vsyncpa [#allocation3], 0  ;;  %s1415_s0 = inlined_call_operand.vmem [shape: f32[16,4], index: 0, kind: input, shape index: {}]   ;;  %s1416_s1 = inlined_call_operand.vmem [shape: f32[2,128], index: 1, kind: input, shape index: {}]   ;;  %s1417_s2 = inlined_call_operand.vmem [shape: f32[1,128], index: 2, kind: input, shape index: {}]   ;;  %s1418_s3 = inlined_call_operand.vmem [shape: f32[6,128], index: 3, kind: input, shape index: {}]   ;;  %s1419_s4 = inlined_call_operand.vmem [shape: f32[2,128], index: 4, kind: input, shape index: {}]   ;;  %s1420_s5 = inlined_call_operand.vmem [shape: f32[1,128], index: 5, kind: input, shape index: {}]   ;;  %s1421_s6 = inlined_call_operand.hbm [shape: bf16[11,128,128], index: 6, kind: input, shape index: {}]   ;;  %s1422_s7 = inlined_call_operand.vmem [shape: f32[11,1,128], index: 7, kind: input, shape index: {}]   ;;  %s1423_s8 = inlined_call_operand.hbm [shape: bf16[11,128,128], index: 8, kind: input, shape index: {}]   ;;  %s1424_s9 = inlined_call_operand.vmem [shape: f32[11,1,128], index: 9, kind: input, shape index: {}]   ;;  %s1425_s10 = inlined_call_operand.vmem [shape: f32[16,128], index: 10, kind: output, shape index: {}]  }
   0x1   :  { %16 = vsyncpa [#allocation5], 0  ;;  %s1257_s13 = smov 0  }
   0x2 LB: > { %s1263_s14 = sadd.s32 4294967295, %s1177_s13   ;;  %p896_p0 = scmp.ge.s32.totalorder %s1177_s13, 1  ;;  %s1177_s13 = sphi %s1257_s13, %s22_s13  }
   0x3   : > { %p268_p1 = scmp.lt.s32.totalorder %s1177_s13, 3  ;;  %s1191_s15 = smov [#allocation2]  }
   0x4   : > { %s295_s16 = sshll.u32 %s1191_s15, 4  ;;  %p1426_p3 = scmp.eq.s32.totalorder %s1263_s14, 0  ;;  %s296_s16 = int_to_ptr.vmem [resolvable:$true] %s295_s16 }
   0x5   : > { %p1267_p2 = pnand %p896_p0, %p268_p1  ;;  %s1192_s18 = smov [#allocation4]  }
   0x6   : > { %s311_s19 = sshll.u32 %s1192_s18, 4  ;;  %s1095_s23 = scalar_lea.hbm %s1421_s6, 11264  ;;  %s1280_s19 = int_to_ptr.vmem [resolvable:$true] %s311_s19 }
   0x7   : > { %s1428_s17 = scalar_select %p1267_p2, 1, 0 }
   0x8   : > { %p1005_p4 = pneg %p1267_p2  ;;  %p1096_p6 = scmp.ne.s32.totalorder %s1421_s6, %s1095_s23 }
   0x9   : > { %p1102_p10 = scmp.lt.u32.totalorder %s1095_s23, %s1421_s6 }
   0xa   : > { %p1276_p5 = pnand %p1426_p3, %p1005_p4 }
   0xc   : > { %p1097_p7 = pneg %p1276_p5 }
   0xe   : > { %p1098_p8 = pnand %p1097_p7, %p1096_p6 }
  0x10   : > { %p1099_p9 = pneg %p1098_p8 }
  0x12   : > { %p1104_p11 = pnand %p1102_p10, %p1099_p9 }
  0x14   : > { %1107 = shalt.err (!%p1104_p11)
}
  0x15   : > { %s1108_s28 = scalar_lea.vmem %s296_s16, 11264  ;;  %p1116_p1 = scmp.lt.s32.totalorder %s296_s16, %s296_s16 }
  0x16   : > { %p1109_p12 = scmp.ne.s32.totalorder %s296_s16, %s1108_s28  ;;  %p1117_p4 = scmp.lt.s32.totalorder %s1108_s28, %s1108_s28 }
  0x18   : > { %p1111_p13 = pnand %p1109_p12, %p1097_p7  ;;  %p1118_p3 = por %p1117_p4, %p1116_p1 }
  0x1a   : > { %p1112_p0 = pneg %p1111_p13 }
  0x1c   : > { %p1119_p2 = pnand %p1118_p3, %p1112_p0 }
  0x1e   : > { %1122 = shalt.err (!%p1119_p2)
}
  0x1f   : > { %s1193_s29 = smov 64   ;;  %s1194_s30 = smov 4  }
  0x20   : > { %1008 = dma.hbm_to_vmem [thread:$0]  (!%p1276_p5), %s1421_s6, 11264, %s296_s16, [#allocation3], %s1193_s29, %s1193_s29, %s1194_s30  }
  0x21   : > { %s1123_s21 = scalar_lea.hbm %s1423_s8, 11264 }
  0x22   : > { %p1124_p6 = scmp.ne.s32.totalorder %s1423_s8, %s1123_s21  ;;  %p1130_p8 = scmp.lt.u32.totalorder %s1123_s21, %s1423_s8 }
  0x24   : > { %p1126_p2 = pnand %p1124_p6, %p1097_p7 }
  0x26   : > { %p1127_p3 = pneg %p1126_p2 }
  0x28   : > { %p1132_p9 = pnand %p1130_p8, %p1127_p3 }
  0x2a   : > { %1135 = shalt.err (!%p1132_p9)
}
  0x2b   : > { %s1136_s16 = scalar_lea.vmem %s1280_s19, 11264  ;;  %p1144_p13 = scmp.lt.s32.totalorder %s1280_s19, %s1280_s19 }
  0x2c   : > { %p1137_p10 = scmp.ne.s32.totalorder %s1280_s19, %s1136_s16  ;;  %p1145_p0 = scmp.lt.s32.totalorder %s1136_s16, %s1136_s16 }
  0x2e   : > { %p1139_p11 = pnand %p1137_p10, %p1097_p7  ;;  %p1146_p1 = por %p1145_p0, %p1144_p13 }
  0x30   : > { %p1140_p12 = pneg %p1139_p11 }
  0x32   : > { %p1147_p4 = pnand %p1146_p1, %p1140_p12 }
  0x34   : > { %1150 = shalt.err (!%p1147_p4)
}
  0x35   : > { %1011 = dma.hbm_to_vmem [thread:$0]  (!%p1276_p5), %s1423_s8, 11264, %s1280_s19, [#allocation5], %s1193_s29, %s1193_s29, %s1194_s30  }
  0x36   : > { %p1430_p6 = scmp.ne.s32.totalorder %s1428_s17, 0 }
  0x37   : > { %p1431_p2 = scmp.eq.s32.totalorder (!%p1430_p6), %s1263_s14, 0 }
  0x38   : > { %337 = sbr.rel (%p1430_p6) target bundleno = 793 (0x319), region = 60 }
  0x3f   : > { %1168 = dma.done.wait (%p1431_p2), [#allocation3], 11264   ;;  %p1432_p7 = pmov %p1431_p2 }
  0x40   : > { %p1433_p3 = pmov %p1431_p2 }
  0x41   : > { %1170 = vsyncadd (%p1432_p7), [#allocation3], 4294956032 }
  0x42   : > { %1172 = dma.done.wait (%p1433_p3), [#allocation5], 11264   ;;  %p1434_p8 = pmov %p1431_p2 }
  0x43   : > { %p377_p9 = scmp.lt.s32.totalorder %s1263_s14, 1  ;;  %v1195_v0 = vmov 0   ;;  %v1196_v1 = vmov 2   ;;  %v387_v2 = vlaneseq  ;;  %v1197_v5 = vmov 0.0   ;;  %v410_v12 = vld [vmem:[%s1418_s3] sm:$0x3f] }
  0x44   : > { %1174 = vsyncadd (%p1434_p8), [#allocation5], 4294956032  ;;  %1059 = vset.pattern.permute.xlu0 %v1195_v0  ;;  %1061 = vset.pattern.permute.xlu1 %v1196_v1  ;;  %v1198_v7 = vmov 1   ;;  %v1199_v8 = vmov 3   ;;  %v911_v21 = vld [vmem:[%s1419_s4] ss:$0 sm:$0xff] }
  0x45   : > { %s1437_s14 = smov (!%p377_p9, %s1263_s14), 1  ;;  %v388_v4 = vand.u32 127, %v387_v2  ;;  %v416_v9 = vshrl.u32 %v387_v2, 7  ;;  %v909_v25 = vld [vmem:[%s1416_s1 + $0x1] ss:$0 sm:$0xff]  ;;  %s1378_s20 = smov 0  }
  0x46   : > { %s903_s17 = sshll.u32 %s1437_s14, 3  ;;  %v912_v26 = vld [vmem:[%s1419_s4 + $0x1] ss:$0 sm:$0xff]  ;;  %v908_v30 = vld [vmem:[%s1416_s1] ss:$0 sm:$0xff] }
  0x47   : > { %s380_s28 = scalar_lea.vmem %s1415_s0, %s903_s17  ;;  %s1347_s11 = scalar_lea.vmem %s1425_s10, %s903_s17  ;;  %vm389_vm0 = vcmp.ge.s32.totalorder %v388_v4, 64  ;;  %v417_v10 = vsub.s32 0, %v416_v9  ;;  %v438_v11 = vsub.s32 3, %v416_v9  ;;  %v426_v13 = vsub.s32 1, %v416_v9  ;;  %v913_v41 = vld [vmem:[%s1420_s5] ss:$0 sm:$0xff] }
  0x48   : > { %v386_v3 = vld [vmem:[%s380_s28] sm:$0xff]  ;;  %v1349_v6 = vsel %vm389_vm0, 1.0, %v1197_v5  ;;  %v443_v14 = vsub.s32 4, %v416_v9  ;;  %vm392_vm1 = vcmp.eq.s32.totalorder %v388_v4, 50  ;;  %v432_v17 = vsub.s32 2, %v416_v9 }
  0x49   : > { %412 = vperm.xlu0 %1059, %v386_v3   ;;  %400 = vperm.xlu1 %1061, %v386_v3   ;;  %v449_v18 = vsub.s32 5, %v416_v9  ;;  %v418_v19 = vrot.slane %v410_v12, %v417_v10  ;;  %v439_v20 = vrot.slane %v410_v12, %v438_v11  ;;  %vm395_vm2 = vcmp.eq.s32.totalorder %v388_v4, 51  ;;  %v910_v52 = vld [vmem:[%s1417_s2] ss:$0 sm:$0xff] }
  0x4a   : > { %v906_v22 = vsel %vm392_vm1, 1.0, %v1197_v5  ;;  %v427_v23 = vrot.slane %v410_v12, %v426_v13  ;;  %v444_v24 = vrot.slane %v410_v12, %v443_v14  ;;  %v907_v27 = vsel %vm395_vm2, 1.0, %v1197_v5 }
  0x4b   : > { %v433_v28 = vrot.slane %v410_v12, %v432_v17  ;;  %v450_v29 = vrot.slane %v410_v12, %v449_v18 }
  0x4d   : > { %1060 = vset.pattern.permute.xlu0 %v1198_v7  ;;  %1062 = vset.pattern.permute.xlu1 %v1199_v8 }
  0x4e   : > { %421 = vperm.xlu0 %1060, %v386_v3   ;;  %405 = vperm.xlu1 %1062, %v386_v3  }
  0xc8   : > { %v413_v15 = vpop.permute.xlu0 %412  ;;  %v401_v16 = vpop.permute.xlu1 %400 }
  0xc9   : > { %v419_v31 = vmul.f32 %v418_v19, %v413_v15  ;;  %v440_v32 = vmul.f32 %v439_v20, %v413_v15  ;;  %v496_v33 = vmul.f32 %v911_v21, %v413_v15  ;;  %v403_v34 = vmul.f32 %v906_v22, %v401_v16 }
  0xca   : > { %v459_v43 = vmul.f32 %v908_v30, %v413_v15 }
  0xcd   : > { %v422_v35 = vpop.permute.xlu0 %421  ;;  %v406_v36 = vpop.permute.xlu1 %405 }
  0xce   : > { %v428_v37 = vmul.f32 %v427_v23, %v422_v35  ;;  %v445_v38 = vmul.f32 %v444_v24, %v422_v35  ;;  %v465_v39 = vmul.f32 %v909_v25, %v422_v35  ;;  %v502_v40 = vmul.f32 %v912_v26, %v422_v35 }
  0xcf   : > { %v408_v42 = vmul.f32 %v907_v27, %v406_v36 }
  0xd0   : > { %v429_v44 = vadd.f32 %v428_v37, %v419_v31  ;;  %v503_v45 = vadd.f32 %v502_v40, %v496_v33  ;;  %v446_v46 = vadd.f32 %v445_v38, %v440_v32  ;;  %v466_v48 = vadd.f32 %v465_v39, %v459_v43 }
  0xd1   : > { %v1369_v47 = vadd.f32 %v408_v42, %v403_v34 }
  0xd2   : > { %v511_v49 = vadd.f32 %v913_v41, %v503_v45  ;;  %v434_v50 = vadd.f32 %v433_v28, %v429_v44  ;;  %v451_v51 = vadd.f32 %v450_v29, %v446_v46  ;;  %v474_v58 = vadd.f32 %v910_v52, %v466_v48 }
  0xd4   : > { %v513_v53 = vand.u32 2147483647, %v511_v49  ;;  %v435_v54 = vmul.f32 %v434_v50, %v401_v16  ;;  %v452_v55 = vmul.f32 %v451_v51, %v406_v36  ;;  %v512_v12 = vmax.f32 %v511_v49, 0.0 }
  0xd6   : > { %v514_v56 = vsub.f32 0.0, %v513_v53  ;;  %v453_v57 = vadd.f32 %v452_v55, %v435_v54 }
  0xd8   : > { %v515_v59 = vmul.f32 1.442695, %v514_v56  ;;  %v475_v60 = vadd.f32 %v474_v58, %v453_v57 }
  0xda   : > { %1063 = vpow2.f32 %v515_v59  ;;  %v477_v61 = vand.u32 2147483647, %v475_v60  ;;  %v476_v20 = vmax.f32 %v475_v60, 0.0 }
  0xdc   : > { %v478_v62 = vsub.f32 0.0, %v477_v61 }
  0xde   : > { %v479_v63 = vmul.f32 1.442695, %v478_v62 }
  0xe0   : > { %1065 = vpow2.f32 %v479_v63 }
  0xe4   : > { %v1064_v0 = vpop.eup %1063 }
  0xe5   : > { %v517_v1 = vadd.f32 1.0, %v1064_v0  ;;  %v520_v3 = vmul.f32 -0.5, %v1064_v0  ;;  %v523_v7 = vand.u32 2147483647, %v1064_v0 }
  0xe7   : > { %1067 = vlog2.f32 %v517_v1  ;;  %v521_v5 = vadd.f32 1.0, %v520_v3  ;;  %vm524_vm3 = vcmp.lt.f32.partialorder %v523_v7, 0.0004427343 }
  0xe9   : > { %v522_v11 = vmul.f32 %v1064_v0, %v521_v5 }
  0xea   : > { %v1066_v2 = vpop.eup %1065 }
  0xeb   : > { %v481_v4 = vadd.f32 1.0, %v1066_v2  ;;  %v484_v8 = vmul.f32 -0.5, %v1066_v2  ;;  %v487_v16 = vand.u32 2147483647, %v1066_v2 }
  0xed   : > { %1069 = vlog2.f32 %v481_v4  ;;  %v485_v14 = vadd.f32 1.0, %v484_v8  ;;  %vm488_vm4 = vcmp.lt.f32.partialorder %v487_v16, 0.0004427343 }
  0xef   : > { %v486_v19 = vmul.f32 %v1066_v2, %v485_v14 }
  0xf1   : > { %v1068_v9 = vpop.eup %1067 }
  0xf2   : > { %v519_v10 = vmul.f32 0.6931472, %v1068_v9 }
  0xf4   : > { %v525_v13 = vsel %vm524_vm3, %v522_v11, %v519_v10 }
  0xf5   : > { %v526_v15 = vadd.f32 %v525_v13, %v512_v12  }
  0xf7   : > { %v1070_v17 = vpop.eup %1069 }
  0xf8   : > { %v483_v18 = vmul.f32 0.6931472, %v1070_v17 }
  0xfa   : > { %v489_v21 = vsel %vm488_vm4, %v486_v19, %v483_v18 }
  0xfb   : > { %v490_v22 = vadd.f32 %v489_v21, %v476_v20  }
  0xfc LB: >> { %v1200_v23 = vmov 0.0   ;;  %vm1201_vm5 = vmmov 0   ;;  %s937_s28 = sshll.u32 %s1189_s20, 6  ;;  %v535_v32 = vpack.c.bf16 %v1185_v15, %v1185_v15  ;;  %s555_s15 = scalar_lea.vmem %s1422_s7, %s1189_s20  ;;  %v667_v61 = vmul.f32 %v1185_v15, %v1349_v6  ;;  %s1189_s20 = sphi %s1378_s20, %s532_s20   ;;  %v1185_v15 = vphi %v526_v15, %v665_v15   ;;  %v1181_v22 = vphi %v490_v22, %v1435_v22  }
  0xfd   : >> { %957 = vmatprep.subr.bf16.mxu0 %v1200_v23  ;;  %973 = vmatprep.mubr.msk.bf16.mxu0 %vm1201_vm5, %v1200_v23  ;;  %s538_s29 = scalar_lea.vmem [#allocation2], %s937_s28  ;;  %s673_s30 = scalar_lea.vmem [#allocation4], %s937_s28  ;;  %v916_v41 = vld [vmem:[%s555_s15] ss:$0 sm:$0xff] }
  0xfe   : >> { %977 = vmatprep.subr.bf16.mxu1 %v1200_v23  ;;  %993 = vmatprep.mubr.msk.bf16.mxu1 %vm1201_vm5, %v1200_v23  ;;  %v1071_v24 = vld [vmem:[%s538_s29] sm:$0xff]   ;;  %v1072_v25 = vld [vmem:[%s538_s29 + $0x8] sm:$0xff]   ;;  %v1073_v26 = vld [vmem:[%s538_s29 + $0x10] sm:$0xff]   ;;  %s690_s22 = scalar_lea.vmem %s1424_s9, %s1189_s20  ;;  %s532_s20 = sadd.s32 1, %s1189_s20  }
  0xff   : >> { %958 = vmatpush3.bf16.msra.mxu0 %v1071_v24  ;;  %v1074_v27 = vld [vmem:[%s538_s29 + $0x18] sm:$0xff]   ;;  %v1075_v28 = vld [vmem:[%s538_s29 + $0x20] sm:$0xff]   ;;  %v1076_v29 = vld [vmem:[%s538_s29 + $0x28] sm:$0xff]   ;;  %p529_p5 = scmp.ge.s32.totalorder %s532_s20, 11  }
 0x100   : >> { %959 = vmatprep.subr.bf16.mxu0 %v1200_v23  ;;  %v1077_v30 = vld [vmem:[%s538_s29 + $0x30] sm:$0xff]   ;;  %v1078_v31 = vld [vmem:[%s538_s29 + $0x38] sm:$0xff]   ;;  %v1079_v33 = vld [vmem:[%s673_s30] sm:$0xff]  }
 0x101   : >> { %978 = vmatpush3.bf16.msra.mxu1 %v1079_v33  ;;  %v1080_v34 = vld [vmem:[%s673_s30 + $0x8] sm:$0xff]   ;;  %v1081_v35 = vld [vmem:[%s673_s30 + $0x10] sm:$0xff]   ;;  %v1082_v36 = vld [vmem:[%s673_s30 + $0x18] sm:$0xff]  }
 0x102   : >> { %979 = vmatprep.subr.bf16.mxu1 %v1200_v23  ;;  %v1083_v37 = vld [vmem:[%s673_s30 + $0x20] sm:$0xff]   ;;  %v1084_v38 = vld [vmem:[%s673_s30 + $0x28] sm:$0xff]   ;;  %v1085_v39 = vld [vmem:[%s673_s30 + $0x30] sm:$0xff]  }
 0x103   : >> { %960 = vmatpush3.bf16.msra.mxu0 %v1072_v25  ;;  %v1086_v40 = vld [vmem:[%s673_s30 + $0x38] sm:$0xff]   ;;  %v926_v3 = vld [vmem:[%s690_s22] ss:$0 sm:$0xff] }
 0x104   : >> { %961 = vmatprep.subr.bf16.mxu0 %v1200_v23 }
 0x105   : >> { %980 = vmatpush3.bf16.msra.mxu1 %v1080_v34 }
 0x106   : >> { %981 = vmatprep.subr.bf16.mxu1 %v1200_v23 }
 0x107   : >> { %962 = vmatpush3.bf16.msra.mxu0 %v1073_v26 }
 0x108   : >> { %963 = vmatprep.subr.bf16.mxu0 %v1200_v23 }
 0x109   : >> { %982 = vmatpush3.bf16.msra.mxu1 %v1081_v35 }
 0x10a   : >> { %983 = vmatprep.subr.bf16.mxu1 %v1200_v23 }
 0x10b   : >> { %964 = vmatpush3.bf16.msra.mxu0 %v1074_v27 }
 0x10c   : >> { %965 = vmatprep.subr.bf16.mxu0 %v1200_v23 }
 0x10d   : >> { %984 = vmatpush3.bf16.msra.mxu1 %v1082_v36 }
 0x10e   : >> { %985 = vmatprep.subr.bf16.mxu1 %v1200_v23 }
 0x10f   : >> { %966 = vmatpush3.bf16.msra.mxu0 %v1075_v28 }
 0x110   : >> { %967 = vmatprep.subr.bf16.mxu0 %v1200_v23 }
 0x111   : >> { %986 = vmatpush3.bf16.msra.mxu1 %v1083_v37 }
 0x112   : >> { %987 = vmatprep.subr.bf16.mxu1 %v1200_v23 }
 0x113   : >> { %968 = vmatpush3.bf16.msra.mxu0 %v1076_v29 }
 0x114   : >> { %969 = vmatprep.subr.bf16.mxu0 %v1200_v23 }
 0x115   : >> { %988 = vmatpush3.bf16.msra.mxu1 %v1084_v38 }
 0x116   : >> { %989 = vmatprep.subr.bf16.mxu1 %v1200_v23 }
 0x117   : >> { %970 = vmatpush3.bf16.msra.mxu0 %v1077_v30 }
 0x118   : >> { %971 = vmatprep.subr.bf16.mxu0 %v1200_v23 }
 0x119   : >> { %990 = vmatpush3.bf16.msra.mxu1 %v1085_v39 }
 0x11a   : >> { %991 = vmatprep.subr.bf16.mxu1 %v1200_v23 }
 0x11b   : >> { %972 = vmatpush3.bf16.msra.mxu0 %v1078_v31 }
 0x11d   : >> { %992 = vmatpush3.bf16.msra.mxu1 %v1086_v40 }
 0x11e   : >> { %974 = vmatmul.mubr.bf16.vlgmr.msra.gmra.mrb[0].mxu0 %v535_v32 }
 0x1f1   : >> { %v645_v42 = vpop.f32.mrb[0].mxu0 }
 0x1f2   : >> { %v646_v43 = vadd.f32 %v916_v41, %v645_v42  ;;  %v975_v44 = vpop.f32.mrb[1].mxu0 }
 0x1f3   : >> { %v648_v45 = vpop.f32.mrb[2].mxu0 }
 0x1f4   : >> { %v652_v46 = vand.u32 2147483647, %v646_v43  ;;  %v976_v48 = vpop.f32.mrb[3].mxu0  ;;  %v651_v59 = vmax.f32 %v646_v43, 0.0  ;;  %v669_v63 = vmul.f32 %v646_v43, %v1369_v47 }
 0x1f6   : >> { %v653_v49 = vsub.f32 0.0, %v652_v46 }
 0x1f8   : >> { %v654_v50 = vmul.f32 1.442695, %v653_v49 }
 0x1fa   : >> { %1087 = vpow2.f32 %v654_v50 }
 0x204   : >> { %v1088_v51 = vpop.eup %1087 }
 0x205   : >> { %v656_v52 = vadd.f32 1.0, %v1088_v51  ;;  %v659_v53 = vmul.f32 -0.5, %v1088_v51  ;;  %v662_v55 = vand.u32 2147483647, %v1088_v51 }
 0x207   : >> { %1089 = vlog2.f32 %v656_v52  ;;  %v660_v54 = vadd.f32 1.0, %v659_v53  ;;  %vm663_vm6 = vcmp.lt.f32.partialorder %v662_v55, 0.0004427343 }
 0x209   : >> { %v661_v58 = vmul.f32 %v1088_v51, %v660_v54 }
 0x211   : >> { %v1090_v56 = vpop.eup %1089 }
 0x212   : >> { %v658_v57 = vmul.f32 0.6931472, %v1090_v56 }
 0x214   : >> { %v664_v60 = vsel %vm663_vm6, %v661_v58, %v658_v57 }
 0x215   : >> { %v665_v15 = vadd.f32 %v664_v60, %v651_v59  }
 0x217   : >> { %v666_v62 = vmul.f32 %v1181_v22, %v665_v15 }
 0x219   : >> { %v668_v0 = vadd.f32 %v667_v61, %v666_v62 }
 0x21b   : >> { %v670_v1 = vadd.f32 %v669_v63, %v668_v0 }
 0x21d   : >> { %v671_v2 = vpack.c.bf16 %v670_v1, %v670_v1 }
 0x21f   : >> { %994 = vmatmul.mubr.bf16.vlgmr.msra.gmra.mrb[0].mxu1 %v671_v2 }
 0x2f2   : >> { %v780_v4 = vpop.f32.mrb[0].mxu1 }
 0x2f3   : >> { %v781_v5 = vadd.f32 %v926_v3, %v780_v4  ;;  %v995_v7 = vpop.f32.mrb[1].mxu1 }
 0x2f4   : >> { %v783_v8 = vpop.f32.mrb[2].mxu1 }
 0x2f5   : >> { %v787_v9 = vand.u32 2147483647, %v781_v5  ;;  %v996_v10 = vpop.f32.mrb[3].mxu1  ;;  %v786_v22 = vmax.f32 %v781_v5, 0.0 }
 0x2f7   : >> { %v788_v11 = vsub.f32 0.0, %v787_v9 }
 0x2f9   : >> { %v789_v12 = vmul.f32 1.442695, %v788_v11 }
 0x2fb   : >> { %1091 = vpow2.f32 %v789_v12 }
 0x305   : >> { %v1092_v13 = vpop.eup %1091 }
 0x306   : >> { %v791_v14 = vadd.f32 1.0, %v1092_v13  ;;  %v794_v16 = vmul.f32 -0.5, %v1092_v13  ;;  %v797_v18 = vand.u32 2147483647, %v1092_v13 }
 0x308   : >> { %1093 = vlog2.f32 %v791_v14  ;;  %v795_v17 = vadd.f32 1.0, %v794_v16  ;;  %vm798_vm7 = vcmp.lt.f32.partialorder %v797_v18, 0.0004427343 }
 0x30a   : >> { %v796_v21 = vmul.f32 %v1092_v13, %v795_v17 }
 0x312   : >> { %v1094_v19 = vpop.eup %1093  ;;  %531 = sbr.rel (!%p529_p5) target bundleno = 252 (0xfc), region = 110 }
 0x313   : >> { %v793_v20 = vmul.f32 0.6931472, %v1094_v19 }
 0x315   : >> { %v799_v23 = vsel %vm798_vm7, %v796_v21, %v793_v20 }
 0x316   : >> { %v800_v24 = vadd.f32 %v799_v23, %v786_v22  }
 0x318   : >> { %v1435_v22 = vmov %v800_v24  ;;  %801 = vst [vmem:[%s1347_s11] sm:$0xff] (%p529_p5), %v800_v24 }
 0x319 PF: > { %s22_s13 = sadd.s32 1, %s1177_s13  }
 0x31a   : > { %p19_p10 = scmp.ge.s32.totalorder %s22_s13, 4  }
 0x31c   :  { %21 = sbr.rel (!%p19_p10) target bundleno = 2 (0x2), region = 121 }
 0x323   :  { %821 = vsyncpa [#allocation3], 1 }
 0x324   :  { %823 = vsyncpa [#allocation3 + $0x1], 1 }
 0x325   :  { %824 = vsyncpa [#allocation5], 1 }

</bundles_post_ra>
